<compile_context>
chip_gen: v7x
topology: tpu7x:2x2x1
jax: 0.10.0
libtpu: 0.0.40
codegen_flags: <defaults>
</compile_context>

<pallas_src>
import jax
import jax.numpy as jnp
import numpy as np
from jax.experimental import pallas as pl
from jax.experimental.pallas import tpu as pltpu


def _upsampled_conv_kernel(x_ref, g_ref, u_ref, w_ref, b_ref, o_ref):
    """One (batch, row-block) grid step.

    x_ref : (1, H, W*Cin)            compute dtype (whole image, revisited)
    g_ref : (1, band_h, H)           row gather/upsample/pad matrix (this block)
    u_ref : (W*Cin, Wpad*Cin)        col gather/upsample/pad matrix (resident)
    w_ref : (KH, Wpad*Cin, Wo*Cout)  banded conv weights (resident)
    b_ref : (1, Wo*Cout)             f32 bias row (resident)
    o_ref : (1, TH, Wo*Cout)         f32 output block
    """
    th = o_ref.shape[1]
    kh = w_ref.shape[0]
    cdt = x_ref.dtype

    # H gather + H-upsample + H-zero-pad: (band_h, H) @ (H, W*Cin)
    rows = jnp.dot(g_ref[0], x_ref[0], preferred_element_type=jnp.float32)
    # W-upsample + W-zero-pad: (band_h, W*Cin) @ (W*Cin, Wpad*Cin)
    band = jnp.dot(rows.astype(cdt), u_ref[...], preferred_element_type=jnp.float32)
    band = band.astype(cdt)  # exact: both matmuls are pure 0/1 selections

    # Conv = KH accumulated banded matmuls; f32 accumulation on the MXU.
    acc = jnp.dot(band[0:th, :], w_ref[0], preferred_element_type=jnp.float32)
    for i in range(1, kh):  # static unroll over kernel rows
        acc = acc + jnp.dot(band[i:i + th, :], w_ref[i],
                            preferred_element_type=jnp.float32)

    o_ref[0] = (acc + b_ref[...]).astype(o_ref.dtype)


def _pick_row_block(ho, max_rows=64):
    """Largest row block (divisor of ho, multiple of 8 unless == ho)."""
    if ho <= max_rows:
        return ho
    for th in range(max_rows, 7, -1):
        if ho % th == 0 and th % 8 == 0:
            return th
    return ho


def upsampled_conv(x, weight, bias, *, stride, padding,
                   compute_dtype=jnp.bfloat16, row_block=None):
    """Forward pass of UpsampledConv (NCHW in / NCHW out).

    x      : (N, Cin, H, W)
    weight : (Cout, Cin, KH, KW)   (PyTorch OIHW)
    bias   : (Cout,)
    stride : nearest-neighbor upsample factor
    padding: conv padding (the conv itself runs with stride 1)
    """
    n, cin, h, w = x.shape
    cout, cin_w, kh, kw = weight.shape
    assert cin == cin_w
    s, p = stride, padding
    hu, wu = h * s, w * s
    hpad, wpad = hu + 2 * p, wu + 2 * p
    ho, wo = hpad - kh + 1, wpad - kw + 1
    assert ho > 0 and wo > 0

    th = row_block if row_block is not None else _pick_row_block(ho)
    assert ho % th == 0 and (th == ho or th % 8 == 0)
    r_blocks = ho // th
    band_h = th + kh - 1

    # ---- trace-time constant structure matrices (tiny; numpy) ----
    # Row gather: band row b of block r <- original row (a-p)//s (or zero pad).
    g_np = np.zeros((r_blocks, band_h, h), np.float32)
    for r in range(r_blocks):
        for b in range(band_h):
            a = r * th + b
            if p <= a < p + hu:
                g_np[r, b, (a - p) // s] = 1.0
    # Column gather (acting on the flattened (W, Cin) lane dim).
    u_np = np.zeros((w * cin, wpad * cin), np.float32)
    for v in range(wpad):
        if p <= v < p + wu:
            src = (v - p) // s
            for c in range(cin):
                u_np[src * cin + c, v * cin + c] = 1.0
    # Banded weights: Wb[i, v*Cin+ci, wo_*Cout+co] = weight[co, ci, i, v-wo_].
    sel_np = np.zeros((kw, wpad, wo), np.float32)
    for j in range(kw):
        for wo_i in range(wo):
            sel_np[j, wo_i + j, wo_i] = 1.0

    g_mat = jnp.asarray(g_np, compute_dtype)
    u_mat = jnp.asarray(u_np, compute_dtype)
    w_band = jnp.einsum('jvw,cdij->ivdwc', jnp.asarray(sel_np, jnp.float32),
                        weight.astype(jnp.float32))
    w_band = w_band.reshape(kh, wpad * cin, wo * cout).astype(compute_dtype)
    bias_row = jnp.tile(bias.astype(jnp.float32), wo).reshape(1, wo * cout)

    # ---- input layout: NCHW -> (N, H, W*Cin) in compute dtype ----
    # (Single small transpose of the *original* tensor; the upsampled image and
    #  the im2col matrix are never materialized in HBM.)
    x2 = jnp.transpose(x, (0, 2, 3, 1)).reshape(n, h, w * cin).astype(compute_dtype)

    out_flat = pl.pallas_call(
        _upsampled_conv_kernel,
        out_shape=jax.ShapeDtypeStruct((n, ho, wo * cout), jnp.float32),
        grid=(n, r_blocks),
        in_specs=[
            pl.BlockSpec((1, h, w * cin), lambda ni, ri: (ni, 0, 0)),           # image
            pl.BlockSpec((1, band_h, h), lambda ni, ri: (ri, 0, 0)),            # G block
            pl.BlockSpec((w * cin, wpad * cin), lambda ni, ri: (0, 0)),         # U (resident)
            pl.BlockSpec((kh, wpad * cin, wo * cout), lambda ni, ri: (0, 0, 0)),# Wb (resident)
            pl.BlockSpec((1, wo * cout), lambda ni, ri: (0, 0)),                # bias row
        ],
        out_specs=pl.BlockSpec((1, th, wo * cout), lambda ni, ri: (ni, ri, 0)),
        compiler_params=pltpu.CompilerParams(
            dimension_semantics=("parallel", "parallel"),
            vmem_limit_bytes=32 * 1024 * 1024,
        ),
    )(x2, g_mat, u_mat, w_band, bias_row)

    out = out_flat.reshape(n, ho, wo, cout)
    return jnp.transpose(out, (0, 3, 1, 2))  # NCHW


if __name__ == "__main__":
    # Module config: UpsampledConv(nn.Conv2d, 4, 8, kernel_size=3, stride=2, padding=1)
    #   -> nearest upsample x2, then Conv2d(4, 8, 3, stride=1, padding=1)
    N, CIN, H, W = 2, 4, 16, 16
    COUT, KH, KW = 8, 3, 3
    STRIDE, PAD = 2, 1

    key = jax.random.PRNGKey(0)
    kx, kw_, kb = jax.random.split(key, 3)
    x = jax.random.normal(kx, (N, CIN, H, W), dtype=jnp.float32)

    # Deterministic parameter init (Conv2d-like uniform bound).
    fan_in = CIN * KH * KW
    bound = 1.0 / np.sqrt(fan_in)
    weight = jax.random.uniform(kw_, (COUT, CIN, KH, KW), jnp.float32, -bound, bound)
    bias = jax.random.uniform(kb, (COUT,), jnp.float32, -bound, bound)

    fwd = jax.jit(upsampled_conv,
                  static_argnames=("stride", "padding", "compute_dtype", "row_block"))
    out = fwd(x, weight, bias, stride=STRIDE, padding=PAD)
    out = jax.block_until_ready(out)
    assert out.shape == (N, COUT, H * STRIDE, W * STRIDE), out.shape

    # References: nearest-upsample + stride-1 conv (same semantics as the module).
    def ref_conv(xr, wr):
        x_up = jnp.repeat(jnp.repeat(xr, STRIDE, axis=2), STRIDE, axis=3)
        return jax.lax.conv_general_dilated(
            x_up, wr, window_strides=(1, 1),
            padding=((PAD, PAD), (PAD, PAD)),
            dimension_numbers=("NCHW", "OIHW", "NCHW"),
            precision=jax.lax.Precision.HIGHEST,
        ) + bias.reshape(1, -1, 1, 1)

    # (a) Tight check against a reference using the same bf16-quantized operands
    #     (kernel does bf16 x bf16 products with f32 accumulation -> ~ULP diff).
    x_q = x.astype(jnp.bfloat16).astype(jnp.float32)
    w_q = weight.astype(jnp.bfloat16).astype(jnp.float32)
    ref_q = ref_conv(x_q, w_q)
    np.testing.assert_allclose(np.asarray(out), np.asarray(ref_q), rtol=2e-3, atol=2e-3)

    # (b) Loose check against the full-f32 reference (bf16 operand rounding only).
    ref_f = ref_conv(x, weight)
    np.testing.assert_allclose(np.asarray(out), np.asarray(ref_f), rtol=5e-2, atol=5e-2)

    print("KERNEL_OK")
</pallas_src>

<mosaic_0001>
module attributes {stable_mosaic.version = 11 : i64} {
  func.func @_upsampled_conv_kernel(%arg0: i32, %arg1: i32, %arg2: memref<1x16x64xbf16, #tpu.memory_space<vmem>>, %arg3: memref<1x34x16xbf16, #tpu.memory_space<vmem>>, %arg4: memref<64x136xbf16, #tpu.memory_space<vmem>>, %arg5: memref<3x136x256xbf16, #tpu.memory_space<vmem>>, %arg6: memref<1x256xf32, #tpu.memory_space<vmem>>, %arg7: memref<1x32x256xf32, #tpu.memory_space<vmem>>) attributes {dimension_semantics = [#tpu.dimension_semantics<parallel>, #tpu.dimension_semantics<parallel>], iteration_bounds = array<i64: 2, 1>, scalar_prefetch = 0 : i64, scratch_operands = 0 : i64, tpu.core_type = #tpu.core_type<tc>, window_params = [{transform_indices = @transform_0, window_bounds = array<i64: 1, 16, 64>}, {transform_indices = @transform_1, window_bounds = array<i64: 1, 34, 16>}, {pipeline_mode = #tpu.pipeline_mode<synchronous>, transform_indices = @transform_2, window_bounds = array<i64: 64, 136>}, {pipeline_mode = #tpu.pipeline_mode<synchronous>, transform_indices = @transform_3, window_bounds = array<i64: 3, 136, 256>}, {pipeline_mode = #tpu.pipeline_mode<synchronous>, transform_indices = @transform_4, window_bounds = array<i64: 1, 256>}, {transform_indices = @transform_5, window_bounds = array<i64: 1, 32, 256>}]} {
    %c0 = arith.constant 0 : index
    %c0_0 = arith.constant 0 : index
    %c0_1 = arith.constant 0 : index
    %0 = vector.load %arg3[%c0, %c0_0, %c0_1] : memref<1x34x16xbf16, #tpu.memory_space<vmem>>, vector<1x34x16xbf16>
    %1 = vector.shape_cast %0 : vector<1x34x16xbf16> to vector<34x16xbf16>
    %c0_2 = arith.constant 0 : index
    %c0_3 = arith.constant 0 : index
    %c0_4 = arith.constant 0 : index
    %2 = vector.load %arg2[%c0_2, %c0_3, %c0_4] : memref<1x16x64xbf16, #tpu.memory_space<vmem>>, vector<1x16x64xbf16>
    %3 = vector.shape_cast %2 : vector<1x16x64xbf16> to vector<16x64xbf16>
    %cst = arith.constant dense<0.000000e+00> : vector<34x64xf32>
    %4 = tpu.matmul %1, %3, %cst {dimension_numbers = #tpu.dot_dimension_numbers<[1], [0], [0], [1], [0, 0, 1, 1], [], []>} : vector<34x16xbf16>, vector<16x64xbf16>, vector<34x64xf32> -> vector<34x64xf32>
    %5 = arith.truncf %4 : vector<34x64xf32> to vector<34x64xbf16>
    %c0_5 = arith.constant 0 : index
    %c0_6 = arith.constant 0 : index
    %6 = vector.load %arg4[%c0_5, %c0_6] : memref<64x136xbf16, #tpu.memory_space<vmem>>, vector<64x136xbf16>
    %cst_7 = arith.constant dense<0.000000e+00> : vector<34x136xf32>
    %7 = tpu.matmul %5, %6, %cst_7 {dimension_numbers = #tpu.dot_dimension_numbers<[1], [0], [0], [1], [0, 0, 1, 1], [], []>} : vector<34x64xbf16>, vector<64x136xbf16>, vector<34x136xf32> -> vector<34x136xf32>
    %8 = arith.truncf %7 : vector<34x136xf32> to vector<34x136xbf16>
    %9 = vector.extract_strided_slice %8 {offsets = [0, 0], sizes = [32, 136], strides = [1, 1]} : vector<34x136xbf16> to vector<32x136xbf16>
    %c0_8 = arith.constant 0 : index
    %c0_9 = arith.constant 0 : index
    %c0_10 = arith.constant 0 : index
    %10 = vector.load %arg5[%c0_8, %c0_9, %c0_10] : memref<3x136x256xbf16, #tpu.memory_space<vmem>>, vector<1x136x256xbf16>
    %11 = vector.shape_cast %10 : vector<1x136x256xbf16> to vector<136x256xbf16>
    %cst_11 = arith.constant dense<0.000000e+00> : vector<32x256xf32>
    %12 = tpu.matmul %9, %11, %cst_11 {dimension_numbers = #tpu.dot_dimension_numbers<[1], [0], [0], [1], [0, 0, 1, 1], [], []>} : vector<32x136xbf16>, vector<136x256xbf16>, vector<32x256xf32> -> vector<32x256xf32>
    %13 = vector.extract_strided_slice %8 {offsets = [1, 0], sizes = [32, 136], strides = [1, 1]} : vector<34x136xbf16> to vector<32x136xbf16>
    %c1 = arith.constant 1 : index
    %c0_12 = arith.constant 0 : index
    %c0_13 = arith.constant 0 : index
    %14 = vector.load %arg5[%c1, %c0_12, %c0_13] : memref<3x136x256xbf16, #tpu.memory_space<vmem>>, vector<1x136x256xbf16>
    %15 = vector.shape_cast %14 : vector<1x136x256xbf16> to vector<136x256xbf16>
    %cst_14 = arith.constant dense<0.000000e+00> : vector<32x256xf32>
    %16 = tpu.matmul %13, %15, %cst_14 {dimension_numbers = #tpu.dot_dimension_numbers<[1], [0], [0], [1], [0, 0, 1, 1], [], []>} : vector<32x136xbf16>, vector<136x256xbf16>, vector<32x256xf32> -> vector<32x256xf32>
    %17 = arith.addf %12, %16 : vector<32x256xf32>
    %18 = vector.extract_strided_slice %8 {offsets = [2, 0], sizes = [32, 136], strides = [1, 1]} : vector<34x136xbf16> to vector<32x136xbf16>
    %c2 = arith.constant 2 : index
    %c0_15 = arith.constant 0 : index
    %c0_16 = arith.constant 0 : index
    %19 = vector.load %arg5[%c2, %c0_15, %c0_16] : memref<3x136x256xbf16, #tpu.memory_space<vmem>>, vector<1x136x256xbf16>
    %20 = vector.shape_cast %19 : vector<1x136x256xbf16> to vector<136x256xbf16>
    %cst_17 = arith.constant dense<0.000000e+00> : vector<32x256xf32>
    %21 = tpu.matmul %18, %20, %cst_17 {dimension_numbers = #tpu.dot_dimension_numbers<[1], [0], [0], [1], [0, 0, 1, 1], [], []>} : vector<32x136xbf16>, vector<136x256xbf16>, vector<32x256xf32> -> vector<32x256xf32>
    %22 = arith.addf %17, %21 : vector<32x256xf32>
    %c0_18 = arith.constant 0 : index
    %c0_19 = arith.constant 0 : index
    %23 = vector.load %arg6[%c0_18, %c0_19] : memref<1x256xf32, #tpu.memory_space<vmem>>, vector<1x256xf32>
    %24 = vector.broadcast %23 : vector<1x256xf32> to vector<32x256xf32>
    %25 = arith.addf %22, %24 : vector<32x256xf32>
    %c0_20 = arith.constant 0 : index
    %c0_21 = arith.constant 0 : index
    %c0_22 = arith.constant 0 : index
    %26 = vector.load %arg7[%c0_20, %c0_21, %c0_22] : memref<1x32x256xf32, #tpu.memory_space<vmem>>, vector<1x32x256xf32>
    %27 = vector.shape_cast %26 : vector<1x32x256xf32> to vector<32x256xf32>
    %28 = vector.shape_cast %25 : vector<32x256xf32> to vector<1x32x256xf32>
    tpu.vector_store %arg7[%c0_20, %c0_21, %c0_22], %28 {strides = array<i32>} : memref<1x32x256xf32, #tpu.memory_space<vmem>>, vector<1x32x256xf32>,
    return
  }
  func.func @transform_0(%arg0: i32, %arg1: i32) -> (i32, i32, i32) {
    %c0_i32 = arith.constant 0 : i32
    %c0_i32_0 = arith.constant 0 : i32
    %c0_i32_1 = arith.constant 0 : i32
    return %arg0, %c0_i32, %c0_i32_0 : i32, i32, i32
  }
  func.func @transform_1(%arg0: i32, %arg1: i32) -> (i32, i32, i32) {
    %c0_i32 = arith.constant 0 : i32
    %c0_i32_0 = arith.constant 0 : i32
    %c0_i32_1 = arith.constant 0 : i32
    return %arg1, %c0_i32, %c0_i32_0 : i32, i32, i32
  }
  func.func @transform_2(%arg0: i32, %arg1: i32) -> (i32, i32) {
    %c0_i32 = arith.constant 0 : i32
    %c0_i32_0 = arith.constant 0 : i32
    %c0_i32_1 = arith.constant 0 : i32
    return %c0_i32, %c0_i32_0 : i32, i32
  }
  func.func @transform_3(%arg0: i32, %arg1: i32) -> (i32, i32, i32) {
    %c0_i32 = arith.constant 0 : i32
    %c0_i32_0 = arith.constant 0 : i32
    %c0_i32_1 = arith.constant 0 : i32
    %c0_i32_2 = arith.constant 0 : i32
    return %c0_i32, %c0_i32_0, %c0_i32_1 : i32, i32, i32
  }
  func.func @transform_4(%arg0: i32, %arg1: i32) -> (i32, i32) {
    %c0_i32 = arith.constant 0 : i32
    %c0_i32_0 = arith.constant 0 : i32
    %c0_i32_1 = arith.constant 0 : i32
    return %c0_i32, %c0_i32_0 : i32, i32
  }
  func.func @transform_5(%arg0: i32, %arg1: i32) -> (i32, i32, i32) {
    %c0_i32 = arith.constant 0 : i32
    %c0_i32_0 = arith.constant 0 : i32
    return %arg0, %arg1, %c0_i32 : i32, i32, i32
  }
}

</mosaic_0001>

<bundles_post_ra>
// kernel: tile.8
= control target key start
LH: loop header
LB: loop body
LE: loop exit
PB: predicated region body
PF: predicated region fallthrough
CT: control target
= control target key end

     0   :  { %s40_s0 = inlined_call_operand.vmem [shape: f32[8], index: 0, kind: input, shape index: {}]   ;;  %s41_s1 = inlined_call_operand.vmem [shape: f32[32,8], index: 1, kind: output, shape index: {}]  }
   0x1   :  { %v4_v0 = vld [vmem:[%s40_s0] ss:$0 sm:$0xff] }
   0x2   :  { %5 = vst [vmem:[%s41_s1] sm:$0xff] %v4_v0  ;;  %12 = vst [vmem:[%s41_s1 + $0x8] sm:$0xff] %v4_v0 }
   0x3   :  { %13 = vst [vmem:[%s41_s1 + $0x10] sm:$0xff] %v4_v0  ;;  %14 = vst [vmem:[%s41_s1 + $0x18] sm:$0xff] %v4_v0 }

// kernel: tile.9
= control target key start
LH: loop header
LB: loop body
LE: loop exit
PB: predicated region body
PF: predicated region fallthrough
CT: control target
= control target key end

     0   :  { %s7_s6 = smov 3  ;;  %s21_s9 = smov 3  ;;  %vm4_vm0 = vcmask 64512   ;;  %vm11_vm1 = vcmask 1048512   ;;  %vm18_vm2 = vcmask 982912   ;;  %vm25_vm3 = vcmask 917312   ;;  %s232_s0 = inlined_call_operand.vmem [shape: f32[32,8], index: 0, kind: input, shape index: {}]   ;;  %s233_s1 = inlined_call_operand.vmem [shape: f32[1,256], index: 1, kind: output, shape index: {}]  }
   0x1   :  { %v122_v0 = vld [vmem:[%s232_s0 + $0xf] ss:$16 sm:%s7_s6]   ;;  %s153_s10 = smov 120   ;;  %v124_v1 = vld [vmem:[%s232_s0 + $0xd] ss:$16 sm:%s21_s9]   ;;  %s14_s13 = smov 3 }
   0x2   :  { %9 = vrot.lane.b32.xlu0 %v122_v0, %s153_s10  ;;  %s154_s14 = smov 104   ;;  %v123_v2 = vld [vmem:[%s232_s0 + $0xe] ss:$16 sm:%s14_s13]   ;;  %s28_s17 = smov 3  ;;  %vm32_vm4 = vcmask 851712   ;;  %vm39_vm5 = vcmask 786112  }
   0x3   :  { %23 = vrot.lane.b32.xlu1 %v124_v1, %s154_s14  ;;  %v125_v3 = vld [vmem:[%s232_s0 + $0xc] ss:$16 sm:%s28_s17]   ;;  %s35_s20 = smov 3  ;;  %s42_s21 = smov 3  ;;  %vm46_vm6 = vcmask 720512   ;;  %vm53_vm7 = vcmask 654912  }
   0x4   :  { %s155_s22 = smov 112   ;;  %s156_s23 = smov 96   ;;  %v126_v4 = vld [vmem:[%s232_s0 + $0xb] ss:$16 sm:%s35_s20]   ;;  %v127_v5 = vld [vmem:[%s232_s0 + $0xa] ss:$16 sm:%s42_s21]  }
   0x5   :  { %s49_s28 = smov 3  ;;  %s56_s29 = smov 3  ;;  %vm60_vm8 = vcmask 589312   ;;  %vm67_vm9 = vcmask 523712   ;;  %vm74_vm10 = vcmask 458112   ;;  %vm81_vm11 = vcmask 392512  }
   0x6   :  { %16 = vrot.lane.b32.xlu0 %v123_v2, %s155_s22  ;;  %s157_s30 = smov 88   ;;  %s158_s2 = smov 80   ;;  %v128_v6 = vld [vmem:[%s232_s0 + $0x9] ss:$16 sm:%s49_s28]   ;;  %vm88_vm12 = vcmask 326912   ;;  %vm95_vm13 = vcmask 261312  }
   0x7   :  { %30 = vrot.lane.b32.xlu1 %v125_v3, %s156_s23  ;;  %v129_v7 = vld [vmem:[%s232_s0 + $0x8] ss:$16 sm:%s56_s29]   ;;  %s63_s7 = smov 3  ;;  %s70_s8 = smov 3  ;;  %vm102_vm14 = vcmask 195712   ;;  %vm109_vm15 = vcmask 130112  }
   0x8   :  { %s159_s9 = smov 72   ;;  %s160_s10 = smov 64   ;;  %v130_v8 = vld [vmem:[%s232_s0 + $0x7] ss:$16 sm:%s63_s7]   ;;  %v131_v9 = vld [vmem:[%s232_s0 + $0x6] ss:$16 sm:%s70_s8]  }
   0x9   :  { %s2_s13 = smov 3  ;;  %s77_s16 = smov 3 }
   0xa   :  { %37 = vrot.lane.b32.xlu0 %v126_v4, %s157_s30  ;;  %v3_v10 = vld [vmem:[%s232_s0] ss:$16 sm:%s2_s13]   ;;  %s84_s19 = smov 3  ;;  %s161_s20 = smov 56  }
   0xb   :  { %44 = vrot.lane.b32.xlu1 %v127_v5, %s158_s2  ;;  %5 = vst.msk [vmem:[#allocation0] ss:$8 sm:$0x3] %vm4_vm0, %v3_v10   ;;  %s162_s21 = smov 48   ;;  %v132_v11 = vld [vmem:[%s232_s0 + $0x5] ss:$16 sm:%s77_s16]  }
   0xc   :  { %v133_v12 = vld [vmem:[%s232_s0 + $0x4] ss:$16 sm:%s84_s19]   ;;  %s91_s26 = smov 3  ;;  %s98_s27 = smov 3 }
   0xd   :  { %s163_s28 = smov 40   ;;  %s164_s29 = smov 32   ;;  %v134_v13 = vld [vmem:[%s232_s0 + $0x3] ss:$16 sm:%s91_s26]   ;;  %v135_v14 = vld [vmem:[%s232_s0 + $0x2] ss:$16 sm:%s98_s27]  }
   0xe   :  { %51 = vrot.lane.b32.xlu0 %v128_v6, %s159_s9  ;;  %s105_s5 = smov 3  ;;  %s165_s6 = smov 24  }
   0xf   :  { %58 = vrot.lane.b32.xlu1 %v129_v7, %s160_s10  ;;  %s166_s7 = smov 16   ;;  %v136_v15 = vld [vmem:[%s232_s0 + $0x1] ss:$16 sm:%s105_s5]   ;;  %s167_s0 = smov 8  }
  0x12   :  { %65 = vrot.lane.b32.xlu0 %v130_v8, %s161_s20 }
  0x13   :  { %72 = vrot.lane.b32.xlu1 %v131_v9, %s162_s21 }
  0x16   :  { %79 = vrot.lane.b32.xlu0 %v132_v11, %s163_s28 }
  0x17   :  { %86 = vrot.lane.b32.xlu1 %v133_v12, %s164_s29 }
  0x1a   :  { %93 = vrot.lane.b32.xlu0 %v134_v13, %s165_s6 }
  0x1b   :  { %100 = vrot.lane.b32.xlu1 %v135_v14, %s166_s7 }
  0x1e   :  { %107 = vrot.lane.b32.xlu0 %v136_v15, %s167_s0 }
  0x74   :  { %v10_v16 = vpop.permute.xlu0 %9  }
  0x75   :  { %12 = vst.msk [vmem:[#allocation0] ss:$8 sm:$0x3] %vm11_vm1, %v10_v16   ;;  %v24_v17 = vpop.permute.xlu1 %23  }
  0x78   :  { %v17_v18 = vpop.permute.xlu0 %16  }
  0x79   :  { %19 = vst.msk [vmem:[#allocation0] ss:$8 sm:$0x3] %vm18_vm2, %v17_v18   ;;  %v31_v19 = vpop.permute.xlu1 %30  }
  0x7a   :  { %26 = vst.msk [vmem:[#allocation0] ss:$8 sm:$0x3] %vm25_vm3, %v24_v17  }
  0x7b   :  { %33 = vst.msk [vmem:[#allocation0] ss:$8 sm:$0x3] %vm32_vm4, %v31_v19  }
  0x7c   :  { %v38_v20 = vpop.permute.xlu0 %37  }
  0x7d   :  { %40 = vst.msk [vmem:[#allocation0] ss:$8 sm:$0x3] %vm39_vm5, %v38_v20   ;;  %v45_v21 = vpop.permute.xlu1 %44  }
  0x7e   :  { %47 = vst.msk [vmem:[#allocation0] ss:$8 sm:$0x3] %vm46_vm6, %v45_v21  }
  0x80   :  { %v52_v22 = vpop.permute.xlu0 %51  }
  0x81   :  { %54 = vst.msk [vmem:[#allocation0] ss:$8 sm:$0x3] %vm53_vm7, %v52_v22   ;;  %v59_v23 = vpop.permute.xlu1 %58  }
  0x82   :  { %61 = vst.msk [vmem:[#allocation0] ss:$8 sm:$0x3] %vm60_vm8, %v59_v23  }
  0x84   :  { %v66_v24 = vpop.permute.xlu0 %65  }
  0x85   :  { %68 = vst.msk [vmem:[#allocation0] ss:$8 sm:$0x3] %vm67_vm9, %v66_v24   ;;  %v73_v25 = vpop.permute.xlu1 %72  }
  0x86   :  { %75 = vst.msk [vmem:[#allocation0] ss:$8 sm:$0x3] %vm74_vm10, %v73_v25  }
  0x88   :  { %v80_v26 = vpop.permute.xlu0 %79  }
  0x89   :  { %82 = vst.msk [vmem:[#allocation0] ss:$8 sm:$0x3] %vm81_vm11, %v80_v26   ;;  %v87_v27 = vpop.permute.xlu1 %86  }
  0x8a   :  { %89 = vst.msk [vmem:[#allocation0] ss:$8 sm:$0x3] %vm88_vm12, %v87_v27  }
  0x8c   :  { %v94_v28 = vpop.permute.xlu0 %93  }
  0x8d   :  { %96 = vst.msk [vmem:[#allocation0] ss:$8 sm:$0x3] %vm95_vm13, %v94_v28   ;;  %v101_v29 = vpop.permute.xlu1 %100  }
  0x8e   :  { %103 = vst.msk [vmem:[#allocation0] ss:$8 sm:$0x3] %vm102_vm14, %v101_v29  }
  0x90   :  { %v108_v30 = vpop.permute.xlu0 %107  }
  0x91   :  { %110 = vst.msk [vmem:[#allocation0] ss:$8 sm:$0x3] %vm109_vm15, %v108_v30  }
  0x98   :  { %v114_v31 = vld [vmem:[#allocation0] sm:$0x1]  ;;  %v118_v32 = vld [vmem:[#allocation0 + $0x8] sm:$0x1] }
  0x99   :  { %116 = vst [vmem:[%s233_s1] sm:$0x1] %v114_v31  ;;  %137 = vst [vmem:[%s233_s1 + $0x1] sm:$0x1] %v118_v32 }

// kernel: upsampled_conv.1
= control target key start
LH: loop header
LB: loop body
LE: loop exit
PB: predicated region body
PF: predicated region fallthrough
CT: control target
= control target key end

     0   :  { %s1535_s18 = smov 0   ;;  %s1537_s19 = smov 0   ;;  %s1790_s0 = inlined_call_operand.vmem [shape: bf16[2,16,64], index: 0, kind: input, shape index: {}]   ;;  %s1791_s1 = inlined_call_operand.vmem [shape: bf16[1,34,16], index: 1, kind: input, shape index: {}]   ;;  %s1792_s2 = inlined_call_operand.vmem [shape: bf16[64,136], index: 2, kind: input, shape index: {}]   ;;  %s1793_s3 = inlined_call_operand.vmem [shape: bf16[3,136,256], index: 3, kind: input, shape index: {}]   ;;  %s1794_s4 = inlined_call_operand.vmem [shape: f32[1,256], index: 4, kind: input, shape index: {}]   ;;  %s1795_s5 = inlined_call_operand.vmem [shape: f32[2,32,256], index: 5, kind: output, shape index: {}]  }
   0x1   :  { %s1539_s20 = smov 0  }
   0x2 LB: > { %s27_s21 = sadd.s32 1, %s1496_s19  ;;  %p1199_p0 = scmp.ge.s32.totalorder %s1500_s20, 1  ;;  %s1500_s20 = sphi %s1539_s20, %s15_s20   ;;  %s1496_s19 = sphi %s1537_s19, %s1797_s19   ;;  %s1492_s18 = sphi %s1535_s18, %s1796_s18  }
   0x3   : > { %p29_p1 = scmp.ge.s32.totalorder %s27_s21, 2  ;;  %p211_p2 = scmp.lt.s32.totalorder %s1500_s20, 3 }
   0x5   : > { %s1799_s21 = smov (%p29_p1, %s27_s21), 0  ;;  %p212_p3 = pnand %p1199_p0, %p211_p2 }
   0x6   : > { %p249_p4 = scmp.lt.s32.totalorder (!%p212_p3), %s1492_s18, 1  ;;  %v1502_v0 = vmov (!%p212_p3), 0.0   ;;  %vm1503_vm0 = vmmov (!%p212_p3), 0   ;;  %v1390_v1 = vld [vmem:[%s1792_s2 + $0x4] ss:$8 sps:$4 sm:$0xff] (!%p212_p3)   ;;  %vm297_vm1 = vcmask (!%p212_p3), 130048  }
   0x7   : > { %215 = sbr.rel (%p212_p3) target bundleno = 719 (0x2cf), region = 40  ;;  %1327 = vmatprep.subr.bf16.mxu1 (!%p212_p3), %v1502_v0  ;;  %1329 = vmatprep.mubr.msk.bf16.mxu1 (!%p212_p3), %vm1503_vm0, %v1502_v0  ;;  %v1385_v3 = vld [vmem:[%s1791_s1] sm:$0xff] (!%p212_p3)   ;;  %v1393_v5 = vld [vmem:[%s1792_s2 + $0x14] ss:$8 sps:$4 sm:$0xff] (!%p212_p3)   ;;  %v1391_v6 = vld [vmem:[%s1792_s2 + $0x10] ss:$8 sps:$4 sm:$0xff] (!%p212_p3)  }
   0x8   : > { %v1388_v4 = vld [vmem:[%s1792_s2] ss:$8 sps:$4 sm:$0xff] (!%p212_p3)   ;;  %v1396_v7 = vld [vmem:[%s1792_s2 + $0x24] ss:$8 sps:$4 sm:$0xff] (!%p212_p3)   ;;  %v1399_v10 = vld [vmem:[%s1792_s2 + $0x34] ss:$8 sps:$4 sm:$0xff] (!%p212_p3)  }
   0x9   : > { %v1386_v8 = vld [vmem:[%s1791_s1 + $0x8] sm:$0xff] (!%p212_p3)   ;;  %v1397_v11 = vld [vmem:[%s1792_s2 + $0x30] ss:$8 sps:$4 sm:$0xff] (!%p212_p3)   ;;  %v1504_v13 = vmov (!%p212_p3), 0   ;;  %v1403_v16 = vld [vmem:[%s1793_s3 + $0x14] ss:$8 sps:$4 sm:$0xff] (!%p212_p3)  }
   0xa   : > { %v1394_v9 = vld [vmem:[%s1792_s2 + $0x20] ss:$8 sps:$4 sm:$0xff] (!%p212_p3)   ;;  %v1387_v12 = vld [vmem:[%s1791_s1 + $0x10] ss:$0 sps:$4 sm:$0x11] (!%p212_p3)   ;;  %vm414_vm2 = vcmask (!%p212_p3), 523264  }
   0xb   : > { %v1400_v14 = vld [vmem:[%s1793_s3 + $0x4] ss:$8 sps:$4 sm:$0xff] (!%p212_p3)   ;;  %v1402_v15 = vld [vmem:[%s1793_s3] ss:$8 sps:$4 sm:$0xff] (!%p212_p3)   ;;  %v1405_v17 = vld [vmem:[%s1793_s3 + $0x10] ss:$8 sps:$4 sm:$0xff] (!%p212_p3)  }
   0xc   : > { %816 = vmatprep.subr.bf16.mxu0 (!%p212_p3), %v1400_v14  ;;  %v1414_v18 = vld [vmem:[%s1793_s3 + $0x8c] ss:$8 sps:$4 sm:$0xff] (!%p212_p3)   ;;  %v1408_v20 = vld [vmem:[%s1793_s3 + $0x20] ss:$8 sps:$4 sm:$0xff] (!%p212_p3)   ;;  %v1411_v22 = vld [vmem:[%s1793_s3 + $0x30] ss:$8 sps:$4 sm:$0xff] (!%p212_p3)  }
   0xd   : > { %817 = vmatpush1.bf16.msra.mxu0 (!%p212_p3), %v1402_v15  ;;  %v1406_v19 = vld [vmem:[%s1793_s3 + $0x24] ss:$8 sps:$4 sm:$0xff] (!%p212_p3)   ;;  %v1409_v21 = vld [vmem:[%s1793_s3 + $0x34] ss:$8 sps:$4 sm:$0xff] (!%p212_p3)   ;;  %v1417_v24 = vld [vmem:[%s1793_s3 + $0x40] ss:$8 sps:$4 sm:$0xff] (!%p212_p3)  }
   0xe   : > { %s1801_s18 = smov (!%p249_p4, %s1492_s18), 1  ;;  %818 = vmatprep.subr.bf16.mxu0 %v1403_v16  ;;  %v1415_v23 = vld [vmem:[%s1793_s3 + $0x44] ss:$8 sps:$4 sm:$0xff]   ;;  %v1421_v25 = vld [vmem:[%s1793_s3 + $0x54] ss:$8 sps:$4 sm:$0xff]   ;;  %vm661_vm3 = vcmask 1043456  }
   0xf   : > { %s1321_s22 = sshll.u32 %s1801_s18, 3  ;;  %v1423_v26 = vld [vmem:[%s1793_s3 + $0x50] ss:$8 sps:$4 sm:$0xff]   ;;  %v1427_v27 = vld [vmem:[%s1793_s3 + $0x64] ss:$8 sps:$4 sm:$0xff]   ;;  %vm654_vm4 = vcmask 64512  }
  0x10   : > { %s253_s25 = scalar_lea.vmem %s1790_s0, %s1321_s22  ;;  %v1429_v28 = vld [vmem:[%s1793_s3 + $0x60] ss:$8 sps:$4 sm:$0xff]   ;;  %v1433_v29 = vld [vmem:[%s1793_s3 + $0x74] ss:$8 sps:$4 sm:$0xff]   ;;  %v1435_v30 = vld [vmem:[%s1793_s3 + $0x70] ss:$8 sps:$4 sm:$0xff]  }
  0x11   : > { %v1384_v2 = vld [vmem:[%s253_s25] sm:$0xff]   ;;  %819 = vmatpush1.bf16.msra.mxu0 %v1405_v17  ;;  %v1412_v34 = vld [vmem:[%s1793_s3 + $0x88] ss:$8 sps:$4 sm:$0xff]   ;;  %v1426_v39 = vld [vmem:[%s1793_s3 + $0xac] ss:$8 sps:$4 sm:$0xff]   ;;  %vm893_vm5 = vcmask 1046528  }
  0x12   : > { %1328 = vmatpush3.bf16.msra.mxu1 %v1384_v2  ;;  %820 = vmatprep.subr.bf16.mxu0 %v1406_v19  ;;  %v1420_v37 = vld [vmem:[%s1793_s3 + $0x9c] ss:$8 sps:$4 sm:$0xff]   ;;  %v1418_v38 = vld [vmem:[%s1793_s3 + $0x98] ss:$8 sps:$4 sm:$0xff]   ;;  %v1424_v43 = vld [vmem:[%s1793_s3 + $0xa8] ss:$8 sps:$4 sm:$0xff]  }
  0x13   : > { %424 = vmatprep.subr.bf16.mxu1 %v1390_v1  ;;  %v1432_v46 = vld [vmem:[%s1793_s3 + $0xbc] ss:$8 sps:$4 sm:$0xff]   ;;  %v1430_v47 = vld [vmem:[%s1793_s3 + $0xb8] ss:$8 sps:$4 sm:$0xff]   ;;  %v1438_v53 = vld [vmem:[%s1793_s3 + $0xcc] ss:$8 sps:$4 sm:$0xff]  }
  0x14   : > { %v1436_v54 = vld [vmem:[%s1793_s3 + $0xc8] ss:$8 sps:$4 sm:$0xff]   ;;  %v507_v55 = vld [vmem:[%s1793_s3 + $0x80] sm:$0xff]  ;;  %v1446_v61 = vld [vmem:[%s1793_s3 + $0x114] ss:$8 sps:$4 sm:$0xff]   ;;  %s1322_s26 = sshll.u32 %s1801_s18, 6 }
  0x15   : > { %1330 = vmatmul.mubr.msk.bf16.vlgmr.msra.gmra.mrb[0].mxu1 %vm297_vm1, %v1385_v3  ;;  %821 = vmatpush1.bf16.msra.mxu0 %v1408_v20  ;;  %v1277_v56 = vcombine.high %v507_v55, %v507_v55  ;;  %v1276_v57 = vcombine.low %v507_v55, %v507_v55  ;;  %v1443_v59 = vld [vmem:[%s1793_s3 + $0xdc] ss:$8 sps:$4 sm:$0xff]   ;;  %v1441_v60 = vld [vmem:[%s1793_s3 + $0xd8] ss:$8 sps:$4 sm:$0xff]   ;;  %v1449_v62 = vld [vmem:[%s1793_s3 + $0xec] ss:$8 sps:$4 sm:$0xff]   ;;  %s268_s29 = scalar_lea.vmem %s1795_s5, %s1322_s26 }
  0x16   : > { %1333 = vmatprep.mubr.msk.bf16.mxu1 %vm1503_vm0, %v1502_v0  ;;  %425 = vmatpush1.bf16.msra.mxu1 %v1388_v4  ;;  %v1447_v63 = vld [vmem:[%s1793_s3 + $0xe8] ss:$8 sps:$4 sm:$0xff]   ;;  %v1453_v1 = vld [vmem:[%s1793_s3 + $0xf8] ss:$8 sps:$4 sm:$0xff]   ;;  %v1458_v19 = vld [vmem:[%s1793_s3 + $0x134] ss:$8 sps:$4 sm:$0xff]  }
  0x17   : > { %426 = vmatprep.subr.bf16.mxu1 %v1393_v5  ;;  %822 = vmatprep.subr.bf16.mxu0 %v1409_v21  ;;  %v811_v58 = vsel %vm661_vm3, %v1276_v57, 0  ;;  %v1238_v2 = vld [vmem:[%s1793_s3 + $0x108] sm:$0xff]  ;;  %vm526_vm6 = vsmask.f32 7424 }
  0x18   : > { %v1256_v3 = vcombine.high %v1238_v2, %v1238_v2  ;;  %v1255_v4 = vcombine.low %v1238_v2, %v1238_v2  ;;  %v1450_v17 = vld [vmem:[%s1793_s3 + $0x120] ss:$8 sps:$4 sm:$0xff]  }
  0x19   : > { %823 = vmatpush1.bf16.msra.mxu0 %v1411_v22 }
  0x1a   : > { %427 = vmatpush1.bf16.msra.mxu1 %v1391_v6  ;;  %824 = vmatprep.subr.bf16.mxu0 %v1415_v23  ;;  %v663_v5 = vsel %vm661_vm3, %v1255_v4, 0 }
  0x1b   : > { %428 = vmatprep.subr.bf16.mxu1 %v1396_v7 }
  0x1d   : > { %1334 = vmatmul.mubr.msk.bf16.gmra.mrb[4].mxu1 %vm297_vm1, %v1386_v8  ;;  %825 = vmatpush1.bf16.msra.mxu0 %v1417_v24 }
  0x1e   : > { %1337 = vmatprep.mubr.msk.bf16.mxu1 %vm1503_vm0, %v1502_v0  ;;  %429 = vmatpush1.bf16.msra.mxu1 %v1394_v9  ;;  %v1455_v0 = vld [vmem:[%s1793_s3 + $0xfc] ss:$8 sps:$4 sm:$0xff]  }
  0x1f   : > { %430 = vmatprep.subr.bf16.mxu1 %v1399_v10  ;;  %826 = vmatprep.subr.bf16.mxu0 %v1421_v25 }
  0x21   : > { %827 = vmatpush1.bf16.msra.mxu0 %v1423_v26  ;;  %v1456_v26 = vld [vmem:[%s1793_s3 + $0x130] ss:$8 sps:$4 sm:$0xff]  }
  0x22   : > { %431 = vmatpush1.bf16.msra.mxu1 %v1397_v11  ;;  %828 = vmatprep.subr.bf16.mxu0 %v1427_v27 }
  0x23   : > { %668 = vmatprep.subr.bf16.mxu1 %v1414_v18 }
  0x25   : > { %1338 = vmatmul.mubr.msk.bf16.gmra.mrb[8].mxu1 %vm297_vm1, %v1387_v12  ;;  %829 = vmatpush1.bf16.msra.mxu0 %v1429_v28  ;;  %v1444_v12 = vld [vmem:[%s1793_s3 + $0x110] ss:$8 sps:$4 sm:$0xff]  }
  0x26   : > { %456 = vmatprep.mubr.bf16.mxu1 %v1504_v13  ;;  %830 = vmatprep.subr.bf16.mxu0 %v1433_v29 }
  0x29   : > { %831 = vmatpush1.bf16.msra.mxu0 %v1435_v30 }
  0x2a   : > { %1278 = vmatprep.subr.msk.bf16.mxu0 %vm661_vm3, %v1277_v56 }
  0x2d   : > { %833 = vmatpush1.bf16.msra.mxu0 %v811_v58 }
  0x2e   : > { %1003 = vmatprep.subr.bf16.mxu0 %v1446_v61 }
  0xe8   : > { %v341_v31 = vpop.f32.mrb[0].mxu1 }
  0xe9   : > { %v1331_v32 = vpop.f32.mrb[1].mxu1 }
  0xea   : > { %v344_v33 = vpop.f32.mrb[2].mxu1 }
  0xeb   : > { %v363_v35 = vpack.c.bf16 %v344_v33, %v341_v31  ;;  %v1332_v36 = vpop.f32.mrb[3].mxu1  ;;  %v1463_v31 = vld [vmem:[%s1793_s3 + $0x144] ss:$8 sps:$4 sm:$0xff]  }
  0xed   : > { %1219 = vmatmul.mubr.msk.bf16.vlgmr.msra.gmra.mrb[12].mxu1 %vm414_vm2, %v363_v35 }
  0xee   : > { %466 = vmatprep.mubr.bf16.mxu1 %v1504_v13  ;;  %669 = vmatpush1.bf16.msra.mxu1 %v1412_v34 }
  0xef   : > { %670 = vmatprep.subr.bf16.mxu1 %v1420_v37 }
  0xf0   : > { %v349_v40 = vpop.f32.mrb[4].mxu1 }
  0xf1   : > { %v1335_v41 = vpop.f32.mrb[5].mxu1 }
  0xf2   : > { %v352_v42 = vpop.f32.mrb[6].mxu1  ;;  %671 = vmatpush1.bf16.msra.mxu1 %v1418_v38 }
  0xf3   : > { %v364_v44 = vpack.c.bf16 %v352_v42, %v349_v40  ;;  %v1336_v45 = vpop.f32.mrb[7].mxu1  ;;  %672 = vmatprep.subr.bf16.mxu1 %v1426_v39  ;;  %v1461_v42 = vld [vmem:[%s1793_s3 + $0x140] ss:$8 sps:$4 sm:$0xff]  }
  0xf5   : > { %1220 = vmatmul.mubr.msk.bf16.gmra.mrb[16].mxu1 %vm414_vm2, %v364_v44 }
  0xf6   : > { %476 = vmatprep.mubr.bf16.mxu1 %v1504_v13  ;;  %673 = vmatpush1.bf16.msra.mxu1 %v1424_v43  ;;  %v1452_v13 = vld [vmem:[%s1793_s3 + $0x124] ss:$8 sps:$4 sm:$0xff]  }
  0xf7   : > { %674 = vmatprep.subr.bf16.mxu1 %v1432_v46 }
  0xf8   : > { %v357_v48 = vpop.f32.mrb[8].mxu1 }
  0xf9   : > { %v365_v49 = vpack.c.bf16 %v357_v48, %v357_v48  ;;  %v1339_v50 = vpop.f32.mrb[9].mxu1 }
  0xfa   : > { %v360_v51 = vpop.f32.mrb[10].mxu1  ;;  %675 = vmatpush1.bf16.msra.mxu1 %v1430_v47 }
  0xfb   : > { %v1340_v52 = vpop.f32.mrb[11].mxu1  ;;  %676 = vmatprep.subr.bf16.mxu1 %v1438_v53 }
  0xfd   : > { %1221 = vmatmul.mubr.msk.bf16.gmra.mrb[20].mxu1 %vm414_vm2, %v365_v49  ;;  %v1466_v49 = vld [vmem:[%s1793_s3 + $0x154] ss:$8 sps:$4 sm:$0xff]  }
  0xfe   : > { %677 = vmatpush1.bf16.msra.mxu1 %v1436_v54 }
  0xff   : > { %678 = vmatprep.subr.bf16.mxu1 %v1443_v59  ;;  %v1464_v59 = vld [vmem:[%s1793_s3 + $0x150] ss:$8 sps:$4 sm:$0xff]  }
 0x102   : > { %679 = vmatpush1.bf16.msra.mxu1 %v1441_v60 }
 0x103   : > { %680 = vmatprep.subr.bf16.mxu1 %v1449_v62  ;;  %v1469_v62 = vld [vmem:[%s1793_s3 + $0x164] ss:$8 sps:$4 sm:$0xff]  }
 0x106   : > { %681 = vmatpush1.bf16.msra.mxu1 %v1447_v63 }
 0x107   : > { %682 = vmatprep.subr.bf16.mxu1 %v1455_v0 }
 0x10a   : > { %683 = vmatpush1.bf16.msra.mxu1 %v1453_v1 }
 0x10b   : > { %1257 = vmatprep.subr.msk.bf16.mxu1 %vm661_vm3, %v1256_v3  ;;  %v1467_v3 = vld [vmem:[%s1793_s3 + $0x160] ss:$8 sps:$4 sm:$0xff]  }
 0x10e   : > { %685 = vmatpush1.bf16.msra.mxu1 %v663_v5  ;;  %v1472_v5 = vld [vmem:[%s1793_s3 + $0x174] ss:$8 sps:$4 sm:$0xff]  }
 0x1c0   : > { %v458_v6 = vpop.f32.mrb[12].mxu1 }
 0x1c1   : > { %v460_v7 = vpop.f32.mrb[13].mxu1 }
 0x1c2   : > { %v462_v8 = vpop.f32.mrb[14].mxu1 }
 0x1c3   : > { %v485_v9 = vpack.c.bf16 %v462_v8, %v458_v6  ;;  %v464_v10 = vpop.f32.mrb[15].mxu1  ;;  %v1470_v6 = vld [vmem:[%s1793_s3 + $0x170] ss:$8 sps:$4 sm:$0xff]  }
 0x1c4   : > { %v486_v11 = vpack.c.bf16 %v464_v10, %v460_v7  ;;  %v1475_v7 = vld [vmem:[%s1793_s3 + $0x184] ss:$8 sps:$4 sm:$0xff]   ;;  %v1297_v8 = vld [vmem:[%s1793_s3 + $0x190] sm:$0xff] }
 0x1c5   : > { %v530_v14 = vshll.u32 %v485_v9, 16  ;;  %v528_v27 = vshrl.u32 %v485_v9, 16  ;;  %v894_v28 = vrot.slane %v485_v9, 1  ;;  %v1315_v10 = vcombine.high %v1297_v8, %v1297_v8 }
 0x1c6   : > { %1279 = vmatprep.mubr.msk.bf16.mxu0 %vm654_vm4, %v486_v11  ;;  %v542_v15 = vshll.u32 %v486_v11, 16  ;;  %v540_v32 = vshrl.u32 %v486_v11, 16  ;;  %v897_v33 = vrot.slane %v486_v11, 1  ;;  %v1314_v11 = vcombine.low %v1297_v8, %v1297_v8 }
 0x1c7   : > { %849 = vmatmul.mubr.bf16.vlgmr.msra.gmra.mrb[0].mxu0 %v485_v9  ;;  %v532_v21 = vrot.slane %v530_v14, 1  ;;  %v1473_v9 = vld [vmem:[%s1793_s3 + $0x180] ss:$8 sps:$4 sm:$0xff]  }
 0x1c8   : > { %1004 = vmatpush1.bf16.msra.mxu0 %v1444_v12  ;;  %v468_v16 = vpop.f32.mrb[16].mxu1  ;;  %v544_v24 = vrot.slane %v542_v15, 1  ;;  %v998_v12 = vsel %vm661_vm3, %v1314_v11, 0 }
 0x1c9   : > { %v470_v18 = vpop.f32.mrb[17].mxu1  ;;  %1005 = vmatprep.subr.bf16.mxu0 %v1452_v13  ;;  %v533_v37 = vor.u32 %v532_v21, %v528_v27 }
 0x1ca   : > { %v472_v20 = vpop.f32.mrb[18].mxu1  ;;  %v545_v43 = vor.u32 %v544_v24, %v540_v32  ;;  %v1064_v24 = vld [vmem:[%s1794_s4] sm:$0x3] }
 0x1cb   : > { %v487_v22 = vpack.c.bf16 %v472_v20, %v468_v16  ;;  %v474_v23 = vpop.f32.mrb[19].mxu1  ;;  %v1066_v20 = vlaneseq }
 0x1cc   : > { %v488_v25 = vpack.c.bf16 %v474_v23, %v470_v18  ;;  %1006 = vmatpush1.bf16.msra.mxu0 %v1450_v17 }
 0x1cd   : > { %v535_v29 = vshll.u32 %v487_v22, 16  ;;  %v895_v30 = vrot.slane %v487_v22, 1  ;;  %1007 = vmatprep.subr.bf16.mxu0 %v1458_v19  ;;  %v551_v38 = vshrl.u32 %v487_v22, 16 }
 0x1ce   : > { %1280 = vmatprep.mubr.msk.bf16.mxu0 %vm654_vm4, %v488_v25  ;;  %v898_v34 = vrot.slane %v488_v25, 1  ;;  %v547_v35 = vshll.u32 %v488_v25, 16  ;;  %v559_v40 = vshrl.u32 %v488_v25, 16 }
 0x1cf   : > { %v537_v36 = vrot.slane %v535_v29, 1  ;;  %859 = vmatmul.mubr.bf16.gmra.mrb[4].mxu0 %v487_v22  ;;  %v896_v39 = vsel %vm893_vm5, %v894_v28, %v895_v30  ;;  %v1067_v22 = vshrl.u32 %v1066_v20, 7 }
 0x1d0   : > { %1008 = vmatpush1.bf16.msra.mxu0 %v1456_v26  ;;  %v899_v41 = vsel %vm893_vm5, %v897_v33, %v898_v34  ;;  %v549_v44 = vrot.slane %v547_v35, 1  ;;  %v478_v45 = vpop.f32.mrb[20].mxu1 }
 0x1d1   : > { %1317 = vmatprep.mubr.msk.bf16.mxu0 %vm654_vm4, %v899_v41  ;;  %1009 = vmatprep.subr.bf16.mxu0 %v1463_v31  ;;  %v489_v46 = vpack.c.bf16 %v478_v45, %v478_v45  ;;  %v538_v47 = vsel %vm526_vm6, %v533_v37, %v537_v36  ;;  %v480_v48 = vpop.f32.mrb[21].mxu1  ;;  %v553_v55 = vor.u32 %v551_v38, %v537_v36  ;;  %v1068_v23 = vsub.s32 0, %v1067_v22 }
 0x1d2   : > { %v550_v50 = vsel %vm526_vm6, %v545_v43, %v549_v44  ;;  %v490_v51 = vpack.c.bf16 %v480_v48, %v480_v48  ;;  %v482_v52 = vpop.f32.mrb[22].mxu1  ;;  %v561_v60 = vor.u32 %v559_v40, %v549_v44  ;;  %v1072_v25 = vsub.s32 1, %v1067_v22 }
 0x1d3   : > { %1258 = vmatprep.mubr.msk.bf16.mxu1 %vm654_vm4, %v550_v50  ;;  %v555_v53 = vshll.u32 %v489_v46, 16  ;;  %v900_v54 = vrot.slane %v489_v46, 1  ;;  %v483_v56 = vpop.f32.mrb[23].mxu1  ;;  %v1069_v26 = vrot.slane %v1064_v24, %v1068_v23 }
 0x1d4   : > { %1010 = vmatpush1.bf16.msra.mxu0 %v1461_v42  ;;  %701 = vmatmul.mubr.bf16.vlgmr.msra.gmra.mrb[24].mxu1 %v538_v47  ;;  %v563_v57 = vshll.u32 %v490_v51, 16  ;;  %v902_v58 = vrot.slane %v490_v51, 1  ;;  %v1073_v28 = vrot.slane %v1064_v24, %v1072_v25 }
 0x1d5   : > { %v557_v61 = vrot.slane %v555_v53, 1  ;;  %1011 = vmatprep.subr.bf16.mxu0 %v1466_v49  ;;  %v901_v63 = vsel %vm893_vm5, %v895_v30, %v900_v54 }
 0x1d6   : > { %v565_v0 = vrot.slane %v563_v57, 1  ;;  %v903_v1 = vsel %vm893_vm5, %v898_v34, %v902_v58 }
 0x1d7   : > { %v558_v2 = vsel %vm526_vm6, %v553_v55, %v557_v61 }
 0x1d8   : > { %1012 = vmatpush1.bf16.msra.mxu0 %v1464_v59  ;;  %v566_v4 = vsel %vm526_vm6, %v561_v60, %v565_v0 }
 0x1d9   : > { %1013 = vmatprep.subr.bf16.mxu0 %v1469_v62  ;;  %1259 = vmatprep.mubr.msk.bf16.mxu1 %vm654_vm4, %v566_v4 }
 0x1dc   : > { %1014 = vmatpush1.bf16.msra.mxu0 %v1467_v3  ;;  %711 = vmatmul.mubr.bf16.gmra.mrb[28].mxu1 %v558_v2 }
 0x1dd   : > { %1015 = vmatprep.subr.bf16.mxu0 %v1472_v5 }
 0x1e0   : > { %1016 = vmatpush1.bf16.msra.mxu0 %v1470_v6 }
 0x1e1   : > { %1017 = vmatprep.subr.bf16.mxu0 %v1475_v7 }
 0x1e4   : > { %1018 = vmatpush1.bf16.msra.mxu0 %v1473_v9 }
 0x1e5   : > { %1316 = vmatprep.subr.msk.bf16.mxu0 %vm661_vm3, %v1315_v10 }
 0x1e8   : > { %1020 = vmatpush1.bf16.msra.mxu0 %v998_v12 }
 0x1eb   : > { %1036 = vmatmul.mubr.bf16.vlgmr.msra.gmra.mrb[0].mxu0 %v896_v39 }
 0x1ec   : > { %1318 = vmatprep.mubr.msk.bf16.mxu0 %vm654_vm4, %v903_v1 }
 0x1f3   : > { %1046 = vmatmul.mubr.bf16.gmra.mrb[4].mxu0 %v901_v63 }
 0x2a7   : > { %v702_v13 = vpop.f32.mrb[24].mxu1 }
 0x2a8   : > { %v704_v14 = vpop.f32.mrb[25].mxu1 }
 0x2a9   : > { %v706_v15 = vpop.f32.mrb[26].mxu1 }
 0x2aa   : > { %v708_v16 = vpop.f32.mrb[27].mxu1 }
 0x2af   : > { %v712_v17 = vpop.f32.mrb[28].mxu1 }
 0x2b0   : > { %v714_v18 = vpop.f32.mrb[29].mxu1 }
 0x2b1   : > { %v716_v19 = vpop.f32.mrb[30].mxu1 }
 0x2b2   : > { %v718_v21 = vpop.f32.mrb[31].mxu1 }
 0x2be   : > { %v1037_v27 = vpop.f32.mrb[0].mxu0 }
 0x2bf   : > { %v1341_v29 = vadd.f32 %v1037_v27, %v702_v13  ;;  %v1039_v30 = vpop.f32.mrb[1].mxu0 }
 0x2c0   : > { %v1342_v31 = vadd.f32 %v1039_v30, %v704_v14  ;;  %v1041_v32 = vpop.f32.mrb[2].mxu0 }
 0x2c1   : > { %v1076_v33 = vadd.f32 %v1341_v29, %v1069_v26  ;;  %v1343_v34 = vadd.f32 %v1041_v32, %v706_v15  ;;  %v1043_v35 = vpop.f32.mrb[3].mxu0 }
 0x2c2   : > { %v1077_v36 = vadd.f32 %v1342_v31, %v1073_v28  ;;  %v1344_v37 = vadd.f32 %v1043_v35, %v708_v16 }
 0x2c3   : > { %1084 = vst [vmem:[%s268_s29] sm:$0xff] %v1076_v33  ;;  %v1078_v38 = vadd.f32 %v1343_v34, %v1069_v26 }
 0x2c4   : > { %1085 = vst [vmem:[%s268_s29 + $0x8] sm:$0xff] %v1077_v36  ;;  %v1079_v39 = vadd.f32 %v1344_v37, %v1073_v28 }
 0x2c5   : > { %1086 = vst [vmem:[%s268_s29 + $0x10] sm:$0xff] %v1078_v38 }
 0x2c6   : > { %1087 = vst [vmem:[%s268_s29 + $0x18] sm:$0xff] %v1079_v39  ;;  %v1047_v40 = vpop.f32.mrb[4].mxu0 }
 0x2c7   : > { %v1345_v41 = vadd.f32 %v1047_v40, %v712_v17  ;;  %v1049_v42 = vpop.f32.mrb[5].mxu0 }
 0x2c8   : > { %v1346_v43 = vadd.f32 %v1049_v42, %v714_v18  ;;  %v1051_v44 = vpop.f32.mrb[6].mxu0 }
 0x2c9   : > { %v1080_v45 = vadd.f32 %v1345_v41, %v1069_v26  ;;  %v1347_v46 = vadd.f32 %v1051_v44, %v716_v19  ;;  %v1053_v47 = vpop.f32.mrb[7].mxu0 }
 0x2ca   : > { %v1081_v48 = vadd.f32 %v1346_v43, %v1073_v28  ;;  %v1348_v49 = vadd.f32 %v1053_v47, %v718_v21 }
 0x2cb   : > { %1088 = vst [vmem:[%s268_s29 + $0x20] sm:$0xff] %v1080_v45  ;;  %v1082_v50 = vadd.f32 %v1347_v46, %v1069_v26 }
 0x2cc   : > { %1089 = vst [vmem:[%s268_s29 + $0x28] sm:$0xff] %v1081_v48  ;;  %v1083_v51 = vadd.f32 %v1348_v49, %v1073_v28 }
 0x2cd   : > { %1090 = vst [vmem:[%s268_s29 + $0x30] sm:$0xff] %v1082_v50 }
 0x2ce   : > { %1091 = vst [vmem:[%s268_s29 + $0x38] sm:$0xff] %v1083_v51 }
 0x2cf PF: > { %s15_s20 = sadd.s32 1, %s1500_s20   ;;  %s1796_s18 = smov %s1496_s19 }
 0x2d0   : > { %p12_p5 = scmp.ge.s32.totalorder %s15_s20, 4   ;;  %s1797_s19 = smov %s1799_s21 }
 0x2d2   :  { %14 = sbr.rel (!%p12_p5) target bundleno = 2 (0x2), region = 75 }

</bundles_post_ra>
